<compile_context>
chip_gen: v7x
topology: tpu7x:2x2x1
jax: 0.10.0
libtpu: 0.0.40
codegen_flags: <defaults>
</compile_context>

<pallas_src>
import jax
import jax.numpy as jnp
from jax.experimental import pallas as pl
from jax.experimental.pallas import tpu as pltpu

OUT_FEATURES = 13
_K_ALIGN = 512            # keeps tiled activation blocks lane-aligned (mult. of 128)
_MAX_TILE_K = 128 * 1024  # ~6.5 MiB f32 weight / step; ~14 MiB double-buffered


def _cdiv(a, b):
    return -(-a // b)


def _round_up(a, m):
    return _cdiv(a, m) * m


# ---------------------------------------------------------------------------
# Kernels
# ---------------------------------------------------------------------------
def _matvec_kernel_single(x_ref, w_ref, o_ref):
    # Whole reduction in one block: one DMA'd tile, one MXU matmul, one store.
    o_ref[...] = jnp.dot(
        x_ref[...], w_ref[...], preferred_element_type=jnp.float32
    ).astype(o_ref.dtype)


def _matvec_kernel_tiled(x_ref, w_ref, o_ref, acc_ref):
    # K-tiled reduction: (1, tk) @ (tk, 13) accumulated over the K grid axis.
    k = pl.program_id(0)

    @pl.when(k == 0)
    def _():
        acc_ref[...] = jnp.zeros_like(acc_ref)

    acc_ref[...] += jnp.dot(
        x_ref[...], w_ref[...], preferred_element_type=jnp.float32
    )

    @pl.when(k == pl.num_programs(0) - 1)
    def _():
        o_ref[...] = acc_ref[...].astype(o_ref.dtype)


# ---------------------------------------------------------------------------
# Builder: one-time weight prep + jitted forward (prep hoisted out of forward)
# ---------------------------------------------------------------------------
def make_ground_classifier(weight, bias, *, max_tile_k=_MAX_TILE_K,
                           weight_dtype=None):
    """weight: [13, in_f], bias: [13]. Returns forward(x) -> [13]."""
    co, in_f = weight.shape

    # Static tiling plan: pad K to a lane-aligned multiple, split into n_k
    # equal tiles of tk elements each (tk mult. of 512 -> lane/sublane legal).
    kp0 = _round_up(in_f, _K_ALIGN)
    n_k = max(1, _cdiv(kp0, max_tile_k))
    tk = _round_up(_cdiv(kp0, n_k), _K_ALIGN)
    kp = n_k * tk

    # One-time layout prep (NOT in the per-call path): [13, in_f] -> [kp, 13].
    wt = jnp.pad(weight.T, ((0, kp - in_f), (0, 0)))
    if weight_dtype is not None:
        wt = wt.astype(weight_dtype)  # e.g. bf16: halves HBM traffic on v6e/v7x

    if n_k == 1:
        call = pl.pallas_call(
            _matvec_kernel_single,
            out_shape=jax.ShapeDtypeStruct((1, co), jnp.float32),
            grid_spec=pltpu.PrefetchScalarGridSpec(
                num_scalar_prefetch=0,
                grid=(1,),
                in_specs=[
                    pl.BlockSpec((1, kp), lambda k: (0, 0)),    # activations
                    pl.BlockSpec((kp, co), lambda k: (0, 0)),   # full weight
                ],
                out_specs=pl.BlockSpec((1, co), lambda k: (0, 0)),
            ),
            compiler_params=pltpu.CompilerParams(
                dimension_semantics=("arbitrary",),
            ),
        )
    else:
        call = pl.pallas_call(
            _matvec_kernel_tiled,
            out_shape=jax.ShapeDtypeStruct((1, co), jnp.float32),
            grid_spec=pltpu.PrefetchScalarGridSpec(
                num_scalar_prefetch=0,
                grid=(n_k,),
                in_specs=[
                    pl.BlockSpec((1, tk), lambda k: (0, k)),    # activation tile
                    pl.BlockSpec((tk, co), lambda k: (k, 0)),   # weight tile [tk,13]
                ],
                out_specs=pl.BlockSpec((1, co), lambda k: (0, 0)),
                scratch_shapes=[pltpu.VMEM((1, co), jnp.float32)],
            ),
            compiler_params=pltpu.CompilerParams(
                dimension_semantics=("arbitrary",),   # K is a reduction axis
            ),
        )

    @jax.jit
    def forward(x):
        x_flat = x.reshape(1, -1)
        xp = jnp.pad(x_flat, ((0, 0), (0, kp - in_f)))  # zeros contribute 0
        out2d = call(xp, wt)
        return out2d[0] + bias                          # bias added outside kernel

    return forward


# ---------------------------------------------------------------------------
# Pure-JAX reference
# ---------------------------------------------------------------------------
def reference_forward(x, weight, bias):
    return weight @ x.reshape(-1) + bias


# ---------------------------------------------------------------------------
if __name__ == "__main__":
    # Small shapes consistent with the module: x is flattened entirely, so
    # in_features = prod(x.shape).
    N, C, H, W = 2, 4, 16, 16
    in_f = N * C * H * W          # 2048
    out_f = OUT_FEATURES          # 13

    k0, k1, k2 = jax.random.split(jax.random.PRNGKey(0), 3)
    x = jax.random.normal(k0, (N, C, H, W), jnp.float32)
    weight = 0.1 * jax.random.normal(k1, (out_f, in_f), jnp.float32)
    bias = 0.1 * jax.random.normal(k2, (out_f,), jnp.float32)

    ref = jax.block_until_ready(reference_forward(x, weight, bias))

    # 1) Fast path: whole weight fits one VMEM block -> grid=(1,).
    fwd = make_ground_classifier(weight, bias)
    out = jax.block_until_ready(fwd(x))
    assert out.shape == (out_f,), out.shape
    assert jnp.allclose(out, ref, rtol=1e-3, atol=1e-3), \
        f"single-block max abs err {jnp.max(jnp.abs(out - ref))}"

    # 2) Force the K-tiled accumulator path (exercises the pipelined kernel).
    fwd_tiled = make_ground_classifier(weight, bias, max_tile_k=512)
    out_t = jax.block_until_ready(fwd_tiled(x))
    assert jnp.allclose(out_t, ref, rtol=1e-3, atol=1e-3), \
        f"tiled max abs err {jnp.max(jnp.abs(out_t - ref))}"

    print("KERNEL_OK")
</pallas_src>

<mosaic_0001>
module attributes {stable_mosaic.version = 11 : i64} {
  func.func @_matvec_kernel_single(%arg0: i32, %arg1: memref<1x2048xf32, #tpu.memory_space<vmem>>, %arg2: memref<2048x13xf32, #tpu.memory_space<vmem>>, %arg3: memref<1x13xf32, #tpu.memory_space<vmem>>) attributes {dimension_semantics = [#tpu.dimension_semantics<arbitrary>], iteration_bounds = array<i64: 1>, scalar_prefetch = 0 : i64, scratch_operands = 0 : i64, tpu.core_type = #tpu.core_type<tc>, window_params = [{pipeline_mode = #tpu.pipeline_mode<synchronous>, transform_indices = @transform_0, window_bounds = array<i64: 1, 2048>}, {pipeline_mode = #tpu.pipeline_mode<synchronous>, transform_indices = @transform_1, window_bounds = array<i64: 2048, 13>}, {pipeline_mode = #tpu.pipeline_mode<synchronous>, transform_indices = @transform_2, window_bounds = array<i64: 1, 13>}]} {
    %c0 = arith.constant 0 : index
    %c0_0 = arith.constant 0 : index
    %0 = vector.load %arg1[%c0, %c0_0] : memref<1x2048xf32, #tpu.memory_space<vmem>>, vector<1x2048xf32>
    %c0_1 = arith.constant 0 : index
    %c0_2 = arith.constant 0 : index
    %1 = vector.load %arg2[%c0_1, %c0_2] : memref<2048x13xf32, #tpu.memory_space<vmem>>, vector<2048x13xf32>
    %cst = arith.constant dense<0.000000e+00> : vector<1x13xf32>
    %2 = tpu.matmul %0, %1, %cst {dimension_numbers = #tpu.dot_dimension_numbers<[1], [0], [0], [1], [0, 0, 1, 1], [], []>} : vector<1x2048xf32>, vector<2048x13xf32>, vector<1x13xf32> -> vector<1x13xf32>
    %c0_3 = arith.constant 0 : index
    %c0_4 = arith.constant 0 : index
    %3 = vector.load %arg3[%c0_3, %c0_4] : memref<1x13xf32, #tpu.memory_space<vmem>>, vector<1x13xf32>
    tpu.vector_store %arg3[%c0_3, %c0_4], %2 {strides = array<i32>} : memref<1x13xf32, #tpu.memory_space<vmem>>, vector<1x13xf32>,
    return
  }
  func.func @transform_0(%arg0: i32) -> (i32, i32) {
    %c0_i32 = arith.constant 0 : i32
    %c0_i32_0 = arith.constant 0 : i32
    %c0_i32_1 = arith.constant 0 : i32
    return %c0_i32, %c0_i32_0 : i32, i32
  }
  func.func @transform_1(%arg0: i32) -> (i32, i32) {
    %c0_i32 = arith.constant 0 : i32
    %c0_i32_0 = arith.constant 0 : i32
    %c0_i32_1 = arith.constant 0 : i32
    return %c0_i32, %c0_i32_0 : i32, i32
  }
  func.func @transform_2(%arg0: i32) -> (i32, i32) {
    %c0_i32 = arith.constant 0 : i32
    %c0_i32_0 = arith.constant 0 : i32
    %c0_i32_1 = arith.constant 0 : i32
    return %c0_i32, %c0_i32_0 : i32, i32
  }
}

</mosaic_0001>

<bundles_post_ra>
// kernel: forward.1
= control target key start
LH: loop header
LB: loop body
LE: loop exit
PB: predicated region body
PF: predicated region fallthrough
CT: control target
= control target key end

     0   :  { %7 = vsyncpa [#allocation3], 0  ;;  %s1495_s9 = smov [#allocation2]   ;;  %s1596_s0 = inlined_call_operand.vmem [shape: f32[1,2048], index: 0, kind: input, shape index: {}]   ;;  %s1597_s1 = inlined_call_operand.hbm [shape: f32[2048,13], index: 1, kind: input, shape index: {}]   ;;  %s1598_s2 = inlined_call_operand.vmem [shape: f32[1,13], index: 2, kind: output, shape index: {}]  }
   0x1   :  { %s15_s10 = sshll.u32 %s1495_s9, 4  ;;  %s1471_s13 = scalar_lea.hbm %s1597_s1, 32768  ;;  %s16_s10 = int_to_ptr.vmem [resolvable:$true] %s15_s10 }
   0x2   :  { %p1472_p0 = scmp.ne.s32.totalorder %s1597_s1, %s1471_s13  ;;  %p1475_p1 = scmp.lt.u32.totalorder %s1471_s13, %s1597_s1 }
   0x4   :  { %p1477_p2 = pnand %p1475_p1, %p1472_p0 }
   0x6   :  { %1480 = shalt.err (!%p1477_p2)
}
   0x7   :  { %s1481_s18 = scalar_lea.vmem %s16_s10, 32768  ;;  %p1486_p4 = scmp.lt.s32.totalorder %s16_s10, %s16_s10 }
   0x8   :  { %p1482_p3 = scmp.ne.s32.totalorder %s16_s10, %s1481_s18  ;;  %p1487_p5 = scmp.lt.s32.totalorder %s1481_s18, %s1481_s18 }
   0xa   :  { %p1488_p6 = por %p1487_p5, %p1486_p4 }
   0xc   :  { %p1489_p7 = pnand %p1488_p6, %p1482_p3 }
   0xe   :  { %1492 = shalt.err (!%p1489_p7)
}
   0xf   :  { %s1496_s19 = smov 128   ;;  %s1497_s20 = smov 8  }
  0x10   :  { %21 = dma.hbm_to_vmem [thread:$0]  %s1597_s1, 32768, %s16_s10, [#allocation3], %s1496_s19, %s1496_s19, %s1497_s20  }
  0x11   :  { %1493 = dma.done.wait [#allocation3], 32768  }
  0x12   :  { %1494 = vsyncadd [#allocation3], 4294934528  ;;  %v43_v0 = vld [vmem:[#allocation2 + $0x80] sm:$0xff]  ;;  %v44_v1 = vld [vmem:[#allocation2 + $0x88] sm:$0xff]  ;;  %v285_v47 = vlaneseq  ;;  %vm925_vm0 = vcmask 98304  }
  0x13   :  { %v75_v2 = vld [vmem:[#allocation2 + $0x180] sm:$0xff]  ;;  %v1212_v3 = vpack.c.bf16 %v44_v1, %v43_v0  ;;  %v76_v4 = vld [vmem:[#allocation2 + $0x188] sm:$0xff]  ;;  %v45_v11 = vld [vmem:[#allocation2 + $0x90] sm:$0xff] }
  0x14   :  { %v27_v5 = vld [vmem:[#allocation2] sm:$0xff]  ;;  %v28_v6 = vld [vmem:[#allocation2 + $0x8] sm:$0xff]  ;;  %v1244_v7 = vpack.c.bf16 %v76_v4, %v75_v2  ;;  %v46_v13 = vld [vmem:[#allocation2 + $0x98] sm:$0xff]  ;;  %v1525_v61 = vshrl.u32 %v285_v47, 7 }
  0x15   :  { %v1214_v8 = vpack.c.bf16 %v28_v6, %v27_v5  ;;  %v59_v9 = vld [vmem:[#allocation2 + $0x100] sm:$0xff]  ;;  %v60_v10 = vld [vmem:[#allocation2 + $0x108] sm:$0xff]  ;;  %1213 = vmatprep.subr.bf16.mxu0 %v1212_v3  ;;  %v77_v14 = vld [vmem:[#allocation2 + $0x190] sm:$0xff]  ;;  %v1216_v16 = vpack.c.bf16 %v46_v13, %v45_v11 }
  0x16   :  { %v1246_v12 = vpack.c.bf16 %v60_v10, %v59_v9  ;;  %v78_v15 = vld [vmem:[#allocation2 + $0x198] sm:$0xff]  ;;  %1245 = vmatprep.subr.bf16.mxu1 %v1244_v7  ;;  %v29_v18 = vld [vmem:[#allocation2 + $0x10] sm:$0xff]  ;;  %v47_v23 = vld [vmem:[#allocation2 + $0xa0] sm:$0xff]  ;;  %v291_v10 = vsub.s32 1, %v1525_v61  ;;  %v299_v11 = vsub.s32 3, %v1525_v61 }
  0x17   :  { %1215 = vmatpush3.bf16.msra.mxu0 %v1214_v8  ;;  %v1248_v17 = vpack.c.bf16 %v78_v15, %v77_v14  ;;  %v30_v19 = vld [vmem:[#allocation2 + $0x18] sm:$0xff]  ;;  %v61_v20 = vld [vmem:[#allocation2 + $0x110] sm:$0xff]  ;;  %v48_v24 = vld [vmem:[#allocation2 + $0xa8] sm:$0xff] }
  0x18   :  { %1247 = vmatpush3.bf16.msra.mxu1 %v1246_v12  ;;  %v1218_v21 = vpack.c.bf16 %v30_v19, %v29_v18  ;;  %v62_v22 = vld [vmem:[#allocation2 + $0x118] sm:$0xff]  ;;  %1217 = vmatprep.subr.bf16.mxu0 %v1216_v16  ;;  %v1220_v26 = vpack.c.bf16 %v48_v24, %v47_v23  ;;  %v79_v27 = vld [vmem:[#allocation2 + $0x1a0] sm:$0xff]  ;;  %v80_v28 = vld [vmem:[#allocation2 + $0x1a8] sm:$0xff] }
  0x19   :  { %1249 = vmatprep.subr.bf16.mxu1 %v1248_v17  ;;  %v1250_v25 = vpack.c.bf16 %v62_v22, %v61_v20  ;;  %v31_v29 = vld [vmem:[#allocation2 + $0x20] sm:$0xff]  ;;  %v1252_v30 = vpack.c.bf16 %v80_v28, %v79_v27  ;;  %v32_v31 = vld [vmem:[#allocation2 + $0x28] sm:$0xff]  ;;  %v49_v35 = vld [vmem:[#allocation2 + $0xb0] sm:$0xff] }
  0x1a   :  { %v63_v32 = vld [vmem:[#allocation2 + $0x120] sm:$0xff]  ;;  %v64_v33 = vld [vmem:[#allocation2 + $0x128] sm:$0xff]  ;;  %v1222_v34 = vpack.c.bf16 %v32_v31, %v31_v29  ;;  %v50_v36 = vld [vmem:[#allocation2 + $0xb8] sm:$0xff] }
  0x1b   :  { %1219 = vmatpush3.bf16.msra.mxu0 %v1218_v21  ;;  %v81_v37 = vld [vmem:[#allocation2 + $0x1b0] sm:$0xff]  ;;  %v1254_v38 = vpack.c.bf16 %v64_v33, %v63_v32  ;;  %v1224_v39 = vpack.c.bf16 %v50_v36, %v49_v35  ;;  %v82_v40 = vld [vmem:[#allocation2 + $0x1b8] sm:$0xff]  ;;  %v51_v46 = vld [vmem:[#allocation2 + $0xc0] sm:$0xff] }
  0x1c   :  { %1251 = vmatpush3.bf16.msra.mxu1 %v1250_v25  ;;  %1221 = vmatprep.subr.bf16.mxu0 %v1220_v26  ;;  %v33_v41 = vld [vmem:[#allocation2 + $0x30] sm:$0xff]  ;;  %v34_v42 = vld [vmem:[#allocation2 + $0x38] sm:$0xff]  ;;  %v1256_v43 = vpack.c.bf16 %v82_v40, %v81_v37  ;;  %v52_v48 = vld [vmem:[#allocation2 + $0xc8] sm:$0xff] }
  0x1d   :  { %1253 = vmatprep.subr.bf16.mxu1 %v1252_v30  ;;  %v65_v44 = vld [vmem:[#allocation2 + $0x130] sm:$0xff]  ;;  %v66_v45 = vld [vmem:[#allocation2 + $0x138] sm:$0xff]  ;;  %v83_v49 = vld [vmem:[#allocation2 + $0x1c0] sm:$0xff]  ;;  %v1226_v51 = vpack.c.bf16 %v34_v42, %v33_v41  ;;  %v1228_v53 = vpack.c.bf16 %v52_v48, %v51_v46 }
  0x1e   :  { %v84_v50 = vld [vmem:[#allocation2 + $0x1c8] sm:$0xff]  ;;  %v1258_v52 = vpack.c.bf16 %v66_v45, %v65_v44  ;;  %v35_v54 = vld [vmem:[#allocation2 + $0x40] sm:$0xff]  ;;  %v53_v59 = vld [vmem:[#allocation2 + $0xd0] sm:$0xff] }
  0x1f   :  { %1223 = vmatpush3.bf16.msra.mxu0 %v1222_v34  ;;  %v36_v55 = vld [vmem:[#allocation2 + $0x48] sm:$0xff]  ;;  %v67_v56 = vld [vmem:[#allocation2 + $0x140] sm:$0xff]  ;;  %v1260_v57 = vpack.c.bf16 %v84_v50, %v83_v49  ;;  %v54_v60 = vld [vmem:[#allocation2 + $0xd8] sm:$0xff] }
  0x20   :  { %1255 = vmatpush3.bf16.msra.mxu1 %v1254_v38  ;;  %1225 = vmatprep.subr.bf16.mxu0 %v1224_v39  ;;  %v68_v58 = vld [vmem:[#allocation2 + $0x148] sm:$0xff]  ;;  %v85_v62 = vld [vmem:[#allocation2 + $0x1d0] sm:$0xff]  ;;  %v86_v63 = vld [vmem:[#allocation2 + $0x1d8] sm:$0xff]  ;;  %v1230_v0 = vpack.c.bf16 %v36_v55, %v35_v54  ;;  %v1232_v2 = vpack.c.bf16 %v54_v60, %v53_v59  ;;  %v287_v39 = vsub.s32 0, %v1525_v61 }
  0x21   :  { %1257 = vmatprep.subr.bf16.mxu1 %v1256_v43  ;;  %v1262_v1 = vpack.c.bf16 %v68_v58, %v67_v56  ;;  %v37_v3 = vld [vmem:[#allocation2 + $0x50] sm:$0xff]  ;;  %v38_v4 = vld [vmem:[#allocation2 + $0x58] sm:$0xff]  ;;  %v1264_v6 = vpack.c.bf16 %v86_v63, %v85_v62  ;;  %v55_v8 = vld [vmem:[#allocation2 + $0xe0] sm:$0xff]  ;;  %v295_v43 = vsub.s32 2, %v1525_v61 }
  0x22   :  { %v69_v5 = vld [vmem:[#allocation2 + $0x150] sm:$0xff]  ;;  %v70_v7 = vld [vmem:[#allocation2 + $0x158] sm:$0xff]  ;;  %v56_v9 = vld [vmem:[#allocation2 + $0xe8] sm:$0xff]  ;;  %v1234_v14 = vpack.c.bf16 %v38_v4, %v37_v3 }
  0x23   :  { %1227 = vmatpush3.bf16.msra.mxu0 %v1226_v51  ;;  %v87_v12 = vld [vmem:[#allocation2 + $0x1e0] sm:$0xff]  ;;  %v88_v13 = vld [vmem:[#allocation2 + $0x1e8] sm:$0xff]  ;;  %v1266_v16 = vpack.c.bf16 %v70_v7, %v69_v5  ;;  %v1236_v17 = vpack.c.bf16 %v56_v9, %v55_v8  ;;  %v57_v23 = vld [vmem:[#allocation2 + $0xf0] sm:$0xff] }
  0x24   :  { %1259 = vmatpush3.bf16.msra.mxu1 %v1258_v52  ;;  %1229 = vmatprep.subr.bf16.mxu0 %v1228_v53  ;;  %v39_v15 = vld [vmem:[#allocation2 + $0x60] sm:$0xff]  ;;  %v40_v18 = vld [vmem:[#allocation2 + $0x68] sm:$0xff]  ;;  %v1268_v21 = vpack.c.bf16 %v88_v13, %v87_v12  ;;  %v58_v24 = vld [vmem:[#allocation2 + $0xf8] sm:$0xff]  ;;  %v307_v53 = vsub.s32 5, %v1525_v61 }
  0x25   :  { %1261 = vmatprep.subr.bf16.mxu1 %v1260_v57  ;;  %v71_v19 = vld [vmem:[#allocation2 + $0x160] sm:$0xff]  ;;  %v72_v22 = vld [vmem:[#allocation2 + $0x168] sm:$0xff]  ;;  %v89_v27 = vld [vmem:[#allocation2 + $0x1f0] sm:$0xff]  ;;  %v1238_v29 = vpack.c.bf16 %v40_v18, %v39_v15  ;;  %v1240_v31 = vpack.c.bf16 %v58_v24, %v57_v23  ;;  %v315_v57 = vsub.s32 7, %v1525_v61 }
  0x26   :  { %v1532_v20 = vld [vmem:[%s1596_s0] sm:$0xff]  ;;  %v90_v28 = vld [vmem:[#allocation2 + $0x1f8] sm:$0xff]  ;;  %v1270_v30 = vpack.c.bf16 %v72_v22, %v71_v19  ;;  %v41_v32 = vld [vmem:[#allocation2 + $0x70] sm:$0xff] }
  0x27   :  { %1231 = vmatpush3.bf16.msra.mxu0 %v1230_v0  ;;  %v292_v25 = vrot.slane %v1532_v20, %v291_v10  ;;  %v300_v26 = vrot.slane %v1532_v20, %v299_v11  ;;  %v42_v33 = vld [vmem:[#allocation2 + $0x78] sm:$0xff]  ;;  %v73_v34 = vld [vmem:[#allocation2 + $0x170] sm:$0xff]  ;;  %v1272_v35 = vpack.c.bf16 %v90_v28, %v89_v27  ;;  %v107_v37 = vld [vmem:[#allocation2 + $0x280] sm:$0xff]  ;;  %v288_v54 = vrot.slane %v1532_v20, %v287_v39 }
  0x28   :  { %1263 = vmatpush3.bf16.msra.mxu1 %v1262_v1  ;;  %1233 = vmatprep.subr.bf16.mxu0 %v1232_v2  ;;  %v74_v36 = vld [vmem:[#allocation2 + $0x178] sm:$0xff]  ;;  %v108_v38 = vld [vmem:[#allocation2 + $0x288] sm:$0xff]  ;;  %v139_v40 = vld [vmem:[#allocation2 + $0x380] sm:$0xff]  ;;  %v1242_v42 = vpack.c.bf16 %v42_v33, %v41_v32  ;;  %v296_v58 = vrot.slane %v1532_v20, %v295_v43  ;;  %v316_v9 = vrot.slane %v1532_v20, %v315_v57 }
  0x29   :  { %1265 = vmatprep.subr.bf16.mxu1 %v1264_v6  ;;  %429 = vmatprep.mubr.f32.mxu0 %v292_v25  ;;  %v140_v41 = vld [vmem:[#allocation2 + $0x388] sm:$0xff]  ;;  %v1274_v44 = vpack.c.bf16 %v74_v36, %v73_v34  ;;  %v1276_v45 = vpack.c.bf16 %v108_v38, %v107_v37  ;;  %v91_v46 = vld [vmem:[#allocation2 + $0x200] sm:$0xff]  ;;  %v109_v51 = vld [vmem:[#allocation2 + $0x290] sm:$0xff]  ;;  %v308_v6 = vrot.slane %v1532_v20, %v307_v53 }
  0x2a   :  { %499 = vmatprep.mubr.f32.mxu1 %v300_v26  ;;  %v92_v47 = vld [vmem:[#allocation2 + $0x208] sm:$0xff]  ;;  %v123_v48 = vld [vmem:[#allocation2 + $0x300] sm:$0xff]  ;;  %v1308_v49 = vpack.c.bf16 %v140_v41, %v139_v40  ;;  %v110_v52 = vld [vmem:[#allocation2 + $0x298] sm:$0xff] }
  0x2b   :  { %1235 = vmatpush3.bf16.msra.mxu0 %v1234_v14  ;;  %v124_v50 = vld [vmem:[#allocation2 + $0x308] sm:$0xff]  ;;  %v141_v55 = vld [vmem:[#allocation2 + $0x390] sm:$0xff]  ;;  %v142_v56 = vld [vmem:[#allocation2 + $0x398] sm:$0xff]  ;;  %v1278_v59 = vpack.c.bf16 %v92_v47, %v91_v46  ;;  %v1280_v62 = vpack.c.bf16 %v110_v52, %v109_v51 }
  0x2c   :  { %1267 = vmatpush3.bf16.msra.mxu1 %v1266_v16  ;;  %1237 = vmatprep.subr.bf16.mxu0 %v1236_v17  ;;  %v1310_v60 = vpack.c.bf16 %v124_v50, %v123_v48  ;;  %v93_v63 = vld [vmem:[#allocation2 + $0x210] sm:$0xff]  ;;  %v94_v0 = vld [vmem:[#allocation2 + $0x218] sm:$0xff]  ;;  %v1312_v2 = vpack.c.bf16 %v142_v56, %v141_v55  ;;  %v111_v4 = vld [vmem:[#allocation2 + $0x2a0] sm:$0xff] }
  0x2d   :  { %1269 = vmatprep.subr.bf16.mxu1 %v1268_v21  ;;  %v125_v1 = vld [vmem:[#allocation2 + $0x310] sm:$0xff]  ;;  %v126_v3 = vld [vmem:[#allocation2 + $0x318] sm:$0xff]  ;;  %v112_v5 = vld [vmem:[#allocation2 + $0x2a8] sm:$0xff]  ;;  %v1282_v12 = vpack.c.bf16 %v94_v0, %v93_v63 }
  0x2e   :  { %v143_v7 = vld [vmem:[#allocation2 + $0x3a0] sm:$0xff]  ;;  %v144_v8 = vld [vmem:[#allocation2 + $0x3a8] sm:$0xff]  ;;  %v1314_v13 = vpack.c.bf16 %v126_v3, %v125_v1  ;;  %v1284_v14 = vpack.c.bf16 %v112_v5, %v111_v4  ;;  %v113_v21 = vld [vmem:[#allocation2 + $0x2b0] sm:$0xff] }
  0x2f   :  { %1239 = vmatpush3.bf16.msra.mxu0 %v1238_v29  ;;  %v95_v15 = vld [vmem:[#allocation2 + $0x220] sm:$0xff]  ;;  %v96_v16 = vld [vmem:[#allocation2 + $0x228] sm:$0xff]  ;;  %v1316_v18 = vpack.c.bf16 %v144_v8, %v143_v7  ;;  %v114_v22 = vld [vmem:[#allocation2 + $0x2b8] sm:$0xff] }
  0x30   :  { %1271 = vmatpush3.bf16.msra.mxu1 %v1270_v30  ;;  %1241 = vmatprep.subr.bf16.mxu0 %v1240_v31  ;;  %v127_v17 = vld [vmem:[#allocation2 + $0x320] sm:$0xff]  ;;  %v128_v19 = vld [vmem:[#allocation2 + $0x328] sm:$0xff]  ;;  %v145_v23 = vld [vmem:[#allocation2 + $0x3b0] sm:$0xff]  ;;  %v1286_v25 = vpack.c.bf16 %v96_v16, %v95_v15  ;;  %v1288_v27 = vpack.c.bf16 %v114_v22, %v113_v21 }
  0x31   :  { %1273 = vmatprep.subr.bf16.mxu1 %v1272_v35  ;;  %v146_v24 = vld [vmem:[#allocation2 + $0x3b8] sm:$0xff]  ;;  %v1318_v26 = vpack.c.bf16 %v128_v19, %v127_v17  ;;  %v97_v28 = vld [vmem:[#allocation2 + $0x230] sm:$0xff]  ;;  %v115_v33 = vld [vmem:[#allocation2 + $0x2c0] sm:$0xff] }
  0x32   :  { %v98_v29 = vld [vmem:[#allocation2 + $0x238] sm:$0xff]  ;;  %v129_v30 = vld [vmem:[#allocation2 + $0x330] sm:$0xff]  ;;  %v1320_v31 = vpack.c.bf16 %v146_v24, %v145_v23  ;;  %v116_v34 = vld [vmem:[#allocation2 + $0x2c8] sm:$0xff] }
  0x33   :  { %1243 = vmatpush3.bf16.msra.mxu0 %v1242_v42  ;;  %v130_v32 = vld [vmem:[#allocation2 + $0x338] sm:$0xff]  ;;  %v147_v35 = vld [vmem:[#allocation2 + $0x3c0] sm:$0xff]  ;;  %v148_v36 = vld [vmem:[#allocation2 + $0x3c8] sm:$0xff]  ;;  %v1290_v37 = vpack.c.bf16 %v98_v29, %v97_v28  ;;  %v1292_v40 = vpack.c.bf16 %v116_v34, %v115_v33 }
  0x34   :  { %1275 = vmatpush3.bf16.msra.mxu1 %v1274_v44  ;;  %1277 = vmatprep.subr.bf16.mxu0 %v1276_v45  ;;  %v1322_v38 = vpack.c.bf16 %v130_v32, %v129_v30  ;;  %v99_v41 = vld [vmem:[#allocation2 + $0x240] sm:$0xff]  ;;  %v100_v42 = vld [vmem:[#allocation2 + $0x248] sm:$0xff]  ;;  %v1324_v45 = vpack.c.bf16 %v148_v36, %v147_v35  ;;  %v117_v47 = vld [vmem:[#allocation2 + $0x2d0] sm:$0xff] }
  0x35   :  { %1309 = vmatprep.subr.bf16.mxu1 %v1308_v49  ;;  %v131_v44 = vld [vmem:[#allocation2 + $0x340] sm:$0xff]  ;;  %v132_v46 = vld [vmem:[#allocation2 + $0x348] sm:$0xff]  ;;  %v118_v48 = vld [vmem:[#allocation2 + $0x2d8] sm:$0xff]  ;;  %v1294_v51 = vpack.c.bf16 %v100_v42, %v99_v41 }
  0x36   :  { %430 = vmatmul.mubr.f32.vlgmr.msra.gmra.mrb[0].mxu0 %v288_v54  ;;  %v149_v49 = vld [vmem:[#allocation2 + $0x3d0] sm:$0xff]  ;;  %v150_v50 = vld [vmem:[#allocation2 + $0x3d8] sm:$0xff]  ;;  %v1326_v52 = vpack.c.bf16 %v132_v46, %v131_v44  ;;  %v1296_v54 = vpack.c.bf16 %v118_v48, %v117_v47  ;;  %v120_v63 = vld [vmem:[#allocation2 + $0x2e8] sm:$0xff] }
  0x37   :  { %500 = vmatmul.mubr.f32.vlgmr.msra.gmra.mrb[0].mxu1 %v296_v58  ;;  %1279 = vmatpush3.bf16.msra.mxu0 %v1278_v59  ;;  %v101_v55 = vld [vmem:[#allocation2 + $0x250] sm:$0xff]  ;;  %v102_v56 = vld [vmem:[#allocation2 + $0x258] sm:$0xff]  ;;  %v1328_v59 = vpack.c.bf16 %v150_v50, %v149_v49  ;;  %v151_v0 = vld [vmem:[#allocation2 + $0x3e0] sm:$0xff] }
  0x38   :  { %1311 = vmatpush3.bf16.msra.mxu1 %v1310_v60  ;;  %1281 = vmatprep.subr.bf16.mxu0 %v1280_v62  ;;  %v133_v58 = vld [vmem:[#allocation2 + $0x350] sm:$0xff]  ;;  %v134_v60 = vld [vmem:[#allocation2 + $0x358] sm:$0xff]  ;;  %v119_v62 = vld [vmem:[#allocation2 + $0x2e0] sm:$0xff] }
  0x39   :  { %1313 = vmatprep.subr.bf16.mxu1 %v1312_v2  ;;  %569 = vmatprep.mubr.f32.mxu0 %v308_v6  ;;  %v152_v1 = vld [vmem:[#allocation2 + $0x3e8] sm:$0xff]  ;;  %v1298_v2 = vpack.c.bf16 %v102_v56, %v101_v55  ;;  %v1330_v3 = vpack.c.bf16 %v134_v60, %v133_v58  ;;  %v1300_v4 = vpack.c.bf16 %v120_v63, %v119_v62  ;;  %v103_v5 = vld [vmem:[#allocation2 + $0x260] sm:$0xff]  ;;  %v154_v15 = vld [vmem:[#allocation2 + $0x3f8] sm:$0xff] }
  0x3a   :  { %639 = vmatprep.mubr.f32.mxu1 %v316_v9  ;;  %v104_v6 = vld [vmem:[#allocation2 + $0x268] sm:$0xff]  ;;  %v135_v7 = vld [vmem:[#allocation2 + $0x360] sm:$0xff]  ;;  %v1332_v8 = vpack.c.bf16 %v152_v1, %v151_v0  ;;  %v105_v19 = vld [vmem:[#allocation2 + $0x270] sm:$0xff] }
  0x3b   :  { %1283 = vmatpush3.bf16.msra.mxu0 %v1282_v12  ;;  %v136_v9 = vld [vmem:[#allocation2 + $0x368] sm:$0xff]  ;;  %v121_v12 = vld [vmem:[#allocation2 + $0x2f0] sm:$0xff]  ;;  %v1302_v16 = vpack.c.bf16 %v104_v6, %v103_v5  ;;  %v106_v21 = vld [vmem:[#allocation2 + $0x278] sm:$0xff] }
  0x3c   :  { %1315 = vmatpush3.bf16.msra.mxu1 %v1314_v13  ;;  %1285 = vmatprep.subr.bf16.mxu0 %v1284_v14  ;;  %v122_v13 = vld [vmem:[#allocation2 + $0x2f8] sm:$0xff]  ;;  %v153_v14 = vld [vmem:[#allocation2 + $0x3f0] sm:$0xff]  ;;  %v1334_v17 = vpack.c.bf16 %v136_v9, %v135_v7  ;;  %v203_v28 = vld [vmem:[#allocation2 + $0x580] sm:$0xff]  ;;  %v1306_v30 = vpack.c.bf16 %v106_v21, %v105_v19 }
  0x3d   :  { %1317 = vmatprep.subr.bf16.mxu1 %v1316_v18  ;;  %v1304_v18 = vpack.c.bf16 %v122_v13, %v121_v12  ;;  %v137_v22 = vld [vmem:[#allocation2 + $0x370] sm:$0xff]  ;;  %v1336_v23 = vpack.c.bf16 %v154_v15, %v153_v14  ;;  %v138_v24 = vld [vmem:[#allocation2 + $0x378] sm:$0xff]  ;;  %v204_v29 = vld [vmem:[#allocation2 + $0x588] sm:$0xff] }
  0x3e   :  { %v1338_v32 = vpack.c.bf16 %v138_v24, %v137_v22  ;;  %v155_v34 = vld [vmem:[#allocation2 + $0x400] sm:$0xff]  ;;  %v156_v35 = vld [vmem:[#allocation2 + $0x408] sm:$0xff]  ;;  %v174_v41 = vld [vmem:[#allocation2 + $0x498] sm:$0xff] }
  0x3f   :  { %1287 = vmatpush3.bf16.msra.mxu0 %v1286_v25  ;;  %v171_v25 = vld [vmem:[#allocation2 + $0x480] sm:$0xff]  ;;  %v205_v44 = vld [vmem:[#allocation2 + $0x590] sm:$0xff]  ;;  %v1342_v46 = vpack.c.bf16 %v156_v35, %v155_v34  ;;  %v1567_v48 = vld [vmem:[%s1596_s0 + $0x8] sm:$0xff] }
  0x40   :  { %1319 = vmatpush3.bf16.msra.mxu1 %v1318_v26  ;;  %1289 = vmatprep.subr.bf16.mxu0 %v1288_v27  ;;  %v172_v26 = vld [vmem:[#allocation2 + $0x488] sm:$0xff]  ;;  %v303_v27 = vsub.s32 4, %v1525_v61  ;;  %v187_v36 = vld [vmem:[#allocation2 + $0x500] sm:$0xff]  ;;  %v190_v56 = vld [vmem:[#allocation2 + $0x518] sm:$0xff]  ;;  %v332_v63 = vrot.slane %v1567_v48, %v299_v11 }
  0x41   :  { %1321 = vmatprep.subr.bf16.mxu1 %v1320_v31  ;;  %v311_v31 = vsub.s32 6, %v1525_v61  ;;  %v1340_v33 = vpack.c.bf16 %v172_v26, %v171_v25  ;;  %v175_v58 = vld [vmem:[#allocation2 + $0x4a0] sm:$0xff]  ;;  %v208_v62 = vld [vmem:[#allocation2 + $0x5a8] sm:$0xff]  ;;  %v177_v7 = vld [vmem:[#allocation2 + $0x4b0] sm:$0xff] }
  0x42   :  { %v304_v42 = vrot.slane %v1532_v20, %v303_v27  ;;  %v207_v60 = vld [vmem:[#allocation2 + $0x5a0] sm:$0xff]  ;;  %v209_v9 = vld [vmem:[#allocation2 + $0x5b0] sm:$0xff]  ;;  %v210_v12 = vld [vmem:[#allocation2 + $0x5b8] sm:$0xff] }
  0x43   :  { %1291 = vmatpush3.bf16.msra.mxu0 %v1290_v37  ;;  %v1372_v37 = vpack.c.bf16 %v204_v29, %v203_v28  ;;  %v312_v47 = vrot.slane %v1532_v20, %v311_v31  ;;  %v324_v20 = vrot.slane %v1567_v48, %v291_v10  ;;  %v191_v5 = vld [vmem:[#allocation2 + $0x520] sm:$0xff]  ;;  %v1380_v6 = vpack.c.bf16 %v208_v62, %v207_v60  ;;  %v192_v10 = vld [vmem:[#allocation2 + $0x528] sm:$0xff]  ;;  %v161_v15 = vld [vmem:[#allocation2 + $0x430] sm:$0xff] }
  0x44   :  { %1323 = vmatpush3.bf16.msra.mxu1 %v1322_v38  ;;  %1293 = vmatprep.subr.bf16.mxu0 %v1292_v40  ;;  %v188_v38 = vld [vmem:[#allocation2 + $0x508] sm:$0xff]  ;;  %v173_v40 = vld [vmem:[#allocation2 + $0x490] sm:$0xff]  ;;  %v1382_v13 = vpack.c.bf16 %v192_v10, %v191_v5  ;;  %v194_v19 = vld [vmem:[#allocation2 + $0x538] sm:$0xff] }
  0x45   :  { %1325 = vmatprep.subr.bf16.mxu1 %v1324_v45  ;;  %v206_v45 = vld [vmem:[#allocation2 + $0x598] sm:$0xff]  ;;  %v1374_v49 = vpack.c.bf16 %v188_v38, %v187_v36  ;;  %v1344_v50 = vpack.c.bf16 %v174_v41, %v173_v40  ;;  %v179_v21 = vld [vmem:[#allocation2 + $0x4c0] sm:$0xff]  ;;  %v180_v22 = vld [vmem:[#allocation2 + $0x4c8] sm:$0xff] }
  0x46   :  { %v1376_v55 = vpack.c.bf16 %v206_v45, %v205_v44  ;;  %v212_v24 = vld [vmem:[#allocation2 + $0x5c8] sm:$0xff]  ;;  %v1356_v28 = vpack.c.bf16 %v180_v22, %v179_v21  ;;  %v163_v29 = vld [vmem:[#allocation2 + $0x440] sm:$0xff]  ;;  %v181_v35 = vld [vmem:[#allocation2 + $0x4d0] sm:$0xff] }
  0x47   :  { %1295 = vmatpush3.bf16.msra.mxu0 %v1294_v51  ;;  %v157_v51 = vld [vmem:[#allocation2 + $0x410] sm:$0xff]  ;;  %v196_v34 = vld [vmem:[#allocation2 + $0x548] sm:$0xff]  ;;  %v182_v36 = vld [vmem:[#allocation2 + $0x4d8] sm:$0xff] }
  0x48   :  { %1327 = vmatpush3.bf16.msra.mxu1 %v1326_v52  ;;  %1297 = vmatprep.subr.bf16.mxu0 %v1296_v54  ;;  %v158_v52 = vld [vmem:[#allocation2 + $0x418] sm:$0xff]  ;;  %v189_v54 = vld [vmem:[#allocation2 + $0x510] sm:$0xff]  ;;  %v199_v60 = vld [vmem:[#allocation2 + $0x560] sm:$0xff] }
  0x49   :  { %1329 = vmatprep.subr.bf16.mxu1 %v1328_v59  ;;  %v176_v59 = vld [vmem:[#allocation2 + $0x4a8] sm:$0xff]  ;;  %v1346_v0 = vpack.c.bf16 %v158_v52, %v157_v51  ;;  %v1378_v1 = vpack.c.bf16 %v190_v56, %v189_v54  ;;  %v214_v38 = vld [vmem:[#allocation2 + $0x5d8] sm:$0xff]  ;;  %v165_v44 = vld [vmem:[#allocation2 + $0x450] sm:$0xff] }
  0x4a   :  { %v166_v45 = vld [vmem:[#allocation2 + $0x458] sm:$0xff]  ;;  %v184_v51 = vld [vmem:[#allocation2 + $0x4e8] sm:$0xff]  ;;  %v215_v52 = vld [vmem:[#allocation2 + $0x5e0] sm:$0xff] }
  0x4b   :  { %1299 = vmatpush3.bf16.msra.mxu0 %v1298_v2  ;;  %v1348_v2 = vpack.c.bf16 %v176_v59, %v175_v58  ;;  %v216_v54 = vld [vmem:[#allocation2 + $0x5e8] sm:$0xff]  ;;  %v167_v59 = vld [vmem:[#allocation2 + $0x460] sm:$0xff]  ;;  %v169_v10 = vld [vmem:[#allocation2 + $0x470] sm:$0xff] }
  0x4c   :  { %1331 = vmatpush3.bf16.msra.mxu1 %v1330_v3  ;;  %1301 = vmatprep.subr.bf16.mxu0 %v1300_v4  ;;  %v159_v3 = vld [vmem:[#allocation2 + $0x420] sm:$0xff]  ;;  %v160_v4 = vld [vmem:[#allocation2 + $0x428] sm:$0xff]  ;;  %v1396_v62 = vpack.c.bf16 %v216_v54, %v215_v52 }
  0x4d   :  { %1333 = vmatprep.subr.bf16.mxu1 %v1332_v8  ;;  %v178_v8 = vld [vmem:[#allocation2 + $0x4b8] sm:$0xff]  ;;  %v1350_v11 = vpack.c.bf16 %v160_v4, %v159_v3  ;;  %v220_v21 = vld [vmem:[#allocation2 + $0x608] sm:$0xff]  ;;  %v251_v22 = vld [vmem:[#allocation2 + $0x700] sm:$0xff] }
  0x4e   :  { %v1352_v14 = vpack.c.bf16 %v178_v8, %v177_v7  ;;  %v218_v3 = vld [vmem:[#allocation2 + $0x5f8] sm:$0xff]  ;;  %v201_v8 = vld [vmem:[#allocation2 + $0x570] sm:$0xff]  ;;  %v224_v52 = vld [vmem:[#allocation2 + $0x628] sm:$0xff] }
  0x4f   :  { %1303 = vmatpush3.bf16.msra.mxu0 %v1302_v16  ;;  %v162_v16 = vld [vmem:[#allocation2 + $0x438] sm:$0xff]  ;;  %v255_v54 = vld [vmem:[#allocation2 + $0x720] sm:$0xff] }
  0x50   :  { %1335 = vmatpush3.bf16.msra.mxu1 %v1334_v17  ;;  %1305 = vmatprep.subr.bf16.mxu0 %v1304_v18  ;;  %v193_v17 = vld [vmem:[#allocation2 + $0x530] sm:$0xff]  ;;  %v1384_v18 = vpack.c.bf16 %v210_v12, %v209_v9  ;;  %v1354_v25 = vpack.c.bf16 %v162_v16, %v161_v15  ;;  %v170_v7 = vld [vmem:[#allocation2 + $0x478] sm:$0xff]  ;;  %v268_v15 = vld [vmem:[#allocation2 + $0x788] sm:$0xff] }
  0x51   :  { %1337 = vmatprep.subr.bf16.mxu1 %v1336_v23  ;;  %v211_v23 = vld [vmem:[#allocation2 + $0x5c0] sm:$0xff]  ;;  %v1386_v26 = vpack.c.bf16 %v194_v19, %v193_v17  ;;  %v202_v12 = vld [vmem:[#allocation2 + $0x578] sm:$0xff]  ;;  %v1370_v16 = vpack.c.bf16 %v170_v7, %v169_v10  ;;  %v276_v10 = vld [vmem:[#allocation2 + $0x7c8] sm:$0xff] }
  0x52   :  { %v1402_v17 = vpack.c.bf16 %v202_v12, %v201_v8  ;;  %v219_v19 = vld [vmem:[#allocation2 + $0x600] sm:$0xff] }
  0x53   :  { %1307 = vmatpush3.bf16.msra.mxu0 %v1306_v30  ;;  %v164_v30 = vld [vmem:[#allocation2 + $0x448] sm:$0xff]  ;;  %v227_v12 = vld [vmem:[#allocation2 + $0x640] sm:$0xff] }
  0x54   :  { %1339 = vmatpush3.bf16.msra.mxu1 %v1338_v32  ;;  %1341 = vmatprep.subr.bf16.mxu0 %v1340_v33  ;;  %v195_v32 = vld [vmem:[#allocation2 + $0x540] sm:$0xff]  ;;  %v1388_v33 = vpack.c.bf16 %v212_v24, %v211_v23  ;;  %v1358_v40 = vpack.c.bf16 %v164_v30, %v163_v29  ;;  %v252_v24 = vld [vmem:[#allocation2 + $0x708] sm:$0xff]  ;;  %v269_v29 = vld [vmem:[#allocation2 + $0x790] sm:$0xff] }
  0x55   :  { %1373 = vmatprep.subr.bf16.mxu1 %v1372_v37  ;;  %v213_v37 = vld [vmem:[#allocation2 + $0x5d0] sm:$0xff]  ;;  %v1390_v41 = vpack.c.bf16 %v196_v34, %v195_v32  ;;  %v270_v30 = vld [vmem:[#allocation2 + $0x798] sm:$0xff]  ;;  %v1406_v32 = vpack.c.bf16 %v220_v21, %v219_v19  ;;  %v1438_v34 = vpack.c.bf16 %v252_v24, %v251_v22 }
  0x56   :  { %570 = vmatmul.mubr.f32.vlgmr.msra.gmra.mrb[2].mxu0 %v304_v42  ;;  %v1360_v42 = vpack.c.bf16 %v182_v36, %v181_v35  ;;  %v221_v36 = vld [vmem:[#allocation2 + $0x610] sm:$0xff]  ;;  %v278_v19 = vld [vmem:[#allocation2 + $0x7d8] sm:$0xff] }
  0x57   :  { %1343 = vmatpush3.bf16.msra.mxu0 %v1342_v46  ;;  %640 = vmatmul.mubr.f32.vlgmr.msra.gmra.mrb[2].mxu1 %v312_v47  ;;  %v197_v46 = vld [vmem:[#allocation2 + $0x550] sm:$0xff]  ;;  %v1392_v47 = vpack.c.bf16 %v214_v38, %v213_v37  ;;  %v222_v37 = vld [vmem:[#allocation2 + $0x618] sm:$0xff] }
  0x58   :  { %1375 = vmatpush3.bf16.msra.mxu1 %v1374_v49  ;;  %1345 = vmatprep.subr.bf16.mxu0 %v1344_v50  ;;  %v198_v49 = vld [vmem:[#allocation2 + $0x558] sm:$0xff]  ;;  %v183_v50 = vld [vmem:[#allocation2 + $0x4e0] sm:$0xff]  ;;  %v253_v38 = vld [vmem:[#allocation2 + $0x710] sm:$0xff] }
  0x59   :  { %1377 = vmatprep.subr.bf16.mxu1 %v1376_v55  ;;  %709 = vmatprep.mubr.f32.mxu0 %v324_v20  ;;  %v1362_v55 = vpack.c.bf16 %v166_v45, %v165_v44  ;;  %v1394_v56 = vpack.c.bf16 %v198_v49, %v197_v46  ;;  %v1364_v58 = vpack.c.bf16 %v184_v51, %v183_v50  ;;  %v168_v20 = vld [vmem:[#allocation2 + $0x468] sm:$0xff]  ;;  %v271_v45 = vld [vmem:[#allocation2 + $0x7a0] sm:$0xff]  ;;  %v229_v24 = vld [vmem:[#allocation2 + $0x650] sm:$0xff] }
  0x5a   :  { %779 = vmatprep.mubr.f32.mxu1 %v332_v63  ;;  %v200_v63 = vld [vmem:[#allocation2 + $0x568] sm:$0xff]  ;;  %v1366_v4 = vpack.c.bf16 %v168_v20, %v167_v59  ;;  %v340_v44 = vrot.slane %v1567_v48, %v307_v53  ;;  %v223_v51 = vld [vmem:[#allocation2 + $0x620] sm:$0xff]  ;;  %v273_v59 = vld [vmem:[#allocation2 + $0x7b0] sm:$0xff] }
  0x5b   :  { %1347 = vmatpush3.bf16.msra.mxu0 %v1346_v0  ;;  %v185_v0 = vld [vmem:[#allocation2 + $0x4f0] sm:$0xff]  ;;  %v1398_v5 = vpack.c.bf16 %v200_v63, %v199_v60  ;;  %v272_v46 = vld [vmem:[#allocation2 + $0x7a8] sm:$0xff]  ;;  %v274_v20 = vld [vmem:[#allocation2 + $0x7b8] sm:$0xff] }
  0x5c   :  { %1379 = vmatpush3.bf16.msra.mxu1 %v1378_v1  ;;  %1349 = vmatprep.subr.bf16.mxu0 %v1348_v2  ;;  %v186_v1 = vld [vmem:[#allocation2 + $0x4f8] sm:$0xff]  ;;  %v217_v2 = vld [vmem:[#allocation2 + $0x5f0] sm:$0xff]  ;;  %v256_v53 = vld [vmem:[#allocation2 + $0x728] sm:$0xff] }
  0x5d   :  { %1381 = vmatprep.subr.bf16.mxu1 %v1380_v6  ;;  %v1368_v6 = vpack.c.bf16 %v186_v1, %v185_v0  ;;  %v1400_v9 = vpack.c.bf16 %v218_v3, %v217_v2  ;;  %v1446_v60 = vpack.c.bf16 %v256_v53, %v255_v54  ;;  %v225_v63 = vld [vmem:[#allocation2 + $0x630] sm:$0xff]  ;;  %v226_v0 = vld [vmem:[#allocation2 + $0x638] sm:$0xff]  ;;  %v1448_v2 = vpack.c.bf16 %v274_v20, %v273_v59 }
  0x5e   :  { %v257_v1 = vld [vmem:[#allocation2 + $0x730] sm:$0xff]  ;;  %v258_v3 = vld [vmem:[#allocation2 + $0x738] sm:$0xff]  ;;  %v1418_v7 = vpack.c.bf16 %v226_v0, %v225_v63  ;;  %v336_v59 = vrot.slane %v1567_v48, %v303_v27  ;;  %v344_v20 = vrot.slane %v1567_v48, %v311_v31 }
  0x5f   :  { %1351 = vmatpush3.bf16.msra.mxu0 %v1350_v11  ;;  %v235_v11 = vld [vmem:[#allocation2 + $0x680] sm:$0xff]  ;;  %v1450_v8 = vpack.c.bf16 %v258_v3, %v257_v1  ;;  %v266_v53 = vld [vmem:[#allocation2 + $0x778] sm:$0xff] }
  0x60   :  { %1383 = vmatpush3.bf16.msra.mxu1 %v1382_v13  ;;  %1353 = vmatprep.subr.bf16.mxu0 %v1352_v14  ;;  %v236_v13 = vld [vmem:[#allocation2 + $0x688] sm:$0xff]  ;;  %v267_v14 = vld [vmem:[#allocation2 + $0x780] sm:$0xff] }
  0x61   :  { %1385 = vmatprep.subr.bf16.mxu1 %v1384_v18  ;;  %v1404_v18 = vpack.c.bf16 %v236_v13, %v235_v11  ;;  %v1436_v23 = vpack.c.bf16 %v268_v15, %v267_v14  ;;  %v228_v11 = vld [vmem:[#allocation2 + $0x648] sm:$0xff]  ;;  %v259_v13 = vld [vmem:[#allocation2 + $0x740] sm:$0xff] }
  0x62   :  { %v260_v15 = vld [vmem:[#allocation2 + $0x748] sm:$0xff]  ;;  %v1422_v21 = vpack.c.bf16 %v228_v11, %v227_v12 }
  0x63   :  { %1355 = vmatpush3.bf16.msra.mxu0 %v1354_v25  ;;  %v237_v25 = vld [vmem:[#allocation2 + $0x690] sm:$0xff]  ;;  %v1454_v22 = vpack.c.bf16 %v260_v15, %v259_v13 }
  0x64   :  { %1387 = vmatpush3.bf16.msra.mxu1 %v1386_v26  ;;  %1357 = vmatprep.subr.bf16.mxu0 %v1356_v28  ;;  %v238_v26 = vld [vmem:[#allocation2 + $0x698] sm:$0xff]  ;;  %v320_v28 = vrot.slane %v1567_v48, %v287_v39  ;;  %v240_v39 = vld [vmem:[#allocation2 + $0x6a8] sm:$0xff] }
  0x65   :  { %1389 = vmatprep.subr.bf16.mxu1 %v1388_v33  ;;  %v328_v33 = vrot.slane %v1567_v48, %v295_v43  ;;  %v1408_v35 = vpack.c.bf16 %v238_v26, %v237_v25  ;;  %v348_v43 = vrot.slane %v1567_v48, %v315_v57  ;;  %v1414_v57 = vpack.c.bf16 %v224_v52, %v223_v51  ;;  %v230_v25 = vld [vmem:[#allocation2 + $0x658] sm:$0xff]  ;;  %v261_v26 = vld [vmem:[#allocation2 + $0x750] sm:$0xff] }
  0x66   :  { %v233_v51 = vld [vmem:[#allocation2 + $0x670] sm:$0xff]  ;;  %v234_v52 = vld [vmem:[#allocation2 + $0x678] sm:$0xff] }
  0x67   :  { %1359 = vmatpush3.bf16.msra.mxu0 %v1358_v40  ;;  %v1440_v40 = vpack.c.bf16 %v270_v30, %v269_v29  ;;  %v262_v29 = vld [vmem:[#allocation2 + $0x758] sm:$0xff]  ;;  %v247_v30 = vld [vmem:[#allocation2 + $0x6e0] sm:$0xff] }
  0x68   :  { %1391 = vmatpush3.bf16.msra.mxu1 %v1390_v41  ;;  %1361 = vmatprep.subr.bf16.mxu0 %v1360_v42  ;;  %v254_v41 = vld [vmem:[#allocation2 + $0x718] sm:$0xff]  ;;  %v239_v42 = vld [vmem:[#allocation2 + $0x6a0] sm:$0xff] }
  0x69   :  { %1393 = vmatprep.subr.bf16.mxu1 %v1392_v47  ;;  %v1410_v47 = vpack.c.bf16 %v222_v37, %v221_v36  ;;  %v1442_v49 = vpack.c.bf16 %v254_v41, %v253_v38  ;;  %v1412_v50 = vpack.c.bf16 %v240_v39, %v239_v42  ;;  %v1458_v36 = vpack.c.bf16 %v262_v29, %v261_v26  ;;  %v231_v38 = vld [vmem:[#allocation2 + $0x660] sm:$0xff]  ;;  %v264_v39 = vld [vmem:[#allocation2 + $0x768] sm:$0xff] }
  0x6a   :  { %v263_v41 = vld [vmem:[#allocation2 + $0x760] sm:$0xff] }
  0x6b   :  { %1363 = vmatpush3.bf16.msra.mxu0 %v1362_v55  ;;  %v1444_v55 = vpack.c.bf16 %v272_v46, %v271_v45  ;;  %v250_v45 = vld [vmem:[#allocation2 + $0x6f8] sm:$0xff]  ;;  %v281_v46 = vld [vmem:[#allocation2 + $0x7f0] sm:$0xff] }
  0x6c   :  { %1395 = vmatpush3.bf16.msra.mxu1 %v1394_v56  ;;  %1365 = vmatprep.subr.bf16.mxu0 %v1364_v58  ;;  %v241_v56 = vld [vmem:[#allocation2 + $0x6b0] sm:$0xff]  ;;  %v242_v58 = vld [vmem:[#allocation2 + $0x6b8] sm:$0xff] }
  0x6d   :  { %1397 = vmatprep.subr.bf16.mxu1 %v1396_v62  ;;  %v1416_v62 = vpack.c.bf16 %v242_v58, %v241_v56  ;;  %v1434_v56 = vpack.c.bf16 %v234_v52, %v233_v51 }
  0x6f   :  { %1367 = vmatpush3.bf16.msra.mxu0 %v1366_v4  ;;  %v243_v4 = vld [vmem:[#allocation2 + $0x6c0] sm:$0xff] }
  0x70   :  { %1399 = vmatpush3.bf16.msra.mxu1 %v1398_v5  ;;  %1369 = vmatprep.subr.bf16.mxu0 %v1368_v6  ;;  %v244_v5 = vld [vmem:[#allocation2 + $0x6c8] sm:$0xff]  ;;  %v275_v6 = vld [vmem:[#allocation2 + $0x7c0] sm:$0xff] }
  0x71   :  { %1401 = vmatprep.subr.bf16.mxu1 %v1400_v9  ;;  %v1420_v9 = vpack.c.bf16 %v244_v5, %v243_v4  ;;  %v1452_v14 = vpack.c.bf16 %v276_v10, %v275_v6 }
  0x73   :  { %1371 = vmatpush3.bf16.msra.mxu0 %v1370_v16  ;;  %v245_v16 = vld [vmem:[#allocation2 + $0x6d0] sm:$0xff] }
  0x74   :  { %1403 = vmatpush3.bf16.msra.mxu1 %v1402_v17  ;;  %1405 = vmatprep.subr.bf16.mxu0 %v1404_v18  ;;  %v246_v17 = vld [vmem:[#allocation2 + $0x6d8] sm:$0xff]  ;;  %v277_v18 = vld [vmem:[#allocation2 + $0x7d0] sm:$0xff] }
  0x75   :  { %1437 = vmatprep.subr.bf16.mxu1 %v1436_v23  ;;  %v1424_v23 = vpack.c.bf16 %v246_v17, %v245_v16 }
  0x76   :  { %710 = vmatmul.mubr.f32.vlgmr.msra.gmra.mrb[4].mxu0 %v320_v28  ;;  %v1456_v28 = vpack.c.bf16 %v278_v19, %v277_v18 }
  0x77   :  { %1407 = vmatpush3.bf16.msra.mxu0 %v1406_v32  ;;  %780 = vmatmul.mubr.f32.vlgmr.msra.gmra.mrb[4].mxu1 %v328_v33  ;;  %v248_v32 = vld [vmem:[#allocation2 + $0x6e8] sm:$0xff]  ;;  %v279_v33 = vld [vmem:[#allocation2 + $0x7e0] sm:$0xff] }
  0x78   :  { %1439 = vmatpush3.bf16.msra.mxu1 %v1438_v34  ;;  %1409 = vmatprep.subr.bf16.mxu0 %v1408_v35  ;;  %v280_v34 = vld [vmem:[#allocation2 + $0x7e8] sm:$0xff]  ;;  %v1426_v35 = vpack.c.bf16 %v230_v25, %v229_v24  ;;  %v1428_v37 = vpack.c.bf16 %v248_v32, %v247_v30 }
  0x79   :  { %1441 = vmatprep.subr.bf16.mxu1 %v1440_v40  ;;  %849 = vmatprep.mubr.f32.mxu0 %v340_v44  ;;  %v232_v40 = vld [vmem:[#allocation2 + $0x668] sm:$0xff]  ;;  %v1460_v42 = vpack.c.bf16 %v280_v34, %v279_v33  ;;  %v249_v44 = vld [vmem:[#allocation2 + $0x6f0] sm:$0xff] }
  0x7a   :  { %919 = vmatprep.mubr.f32.mxu1 %v348_v43  ;;  %v282_v43 = vld [vmem:[#allocation2 + $0x7f8] sm:$0xff] }
  0x7b   :  { %1411 = vmatpush3.bf16.msra.mxu0 %v1410_v47  ;;  %v1430_v47 = vpack.c.bf16 %v232_v40, %v231_v38  ;;  %v1464_v54 = vpack.c.bf16 %v282_v43, %v281_v46 }
  0x7c   :  { %1443 = vmatpush3.bf16.msra.mxu1 %v1442_v49  ;;  %1413 = vmatprep.subr.bf16.mxu0 %v1412_v50  ;;  %v1462_v49 = vpack.c.bf16 %v264_v39, %v263_v41  ;;  %v1432_v50 = vpack.c.bf16 %v250_v45, %v249_v44 }
  0x7d   :  { %1445 = vmatprep.subr.bf16.mxu1 %v1444_v55  ;;  %v265_v55 = vld [vmem:[#allocation2 + $0x770] sm:$0xff] }
  0x7e   :  { %v1466_v58 = vpack.c.bf16 %v266_v53, %v265_v55 }
  0x7f   :  { %1415 = vmatpush3.bf16.msra.mxu0 %v1414_v57 }
  0x80   :  { %1447 = vmatpush3.bf16.msra.mxu1 %v1446_v60  ;;  %1417 = vmatprep.subr.bf16.mxu0 %v1416_v62 }
  0x81   :  { %1449 = vmatprep.subr.bf16.mxu1 %v1448_v2 }
  0x83   :  { %1419 = vmatpush3.bf16.msra.mxu0 %v1418_v7 }
  0x84   :  { %1451 = vmatpush3.bf16.msra.mxu1 %v1450_v8  ;;  %1421 = vmatprep.subr.bf16.mxu0 %v1420_v9 }
  0x85   :  { %1453 = vmatprep.subr.bf16.mxu1 %v1452_v14 }
  0x87   :  { %1423 = vmatpush3.bf16.msra.mxu0 %v1422_v21 }
  0x88   :  { %1455 = vmatpush3.bf16.msra.mxu1 %v1454_v22  ;;  %1425 = vmatprep.subr.bf16.mxu0 %v1424_v23 }
  0x89   :  { %1457 = vmatprep.subr.bf16.mxu1 %v1456_v28 }
  0x8b   :  { %1427 = vmatpush3.bf16.msra.mxu0 %v1426_v35 }
  0x8c   :  { %1459 = vmatpush3.bf16.msra.mxu1 %v1458_v36  ;;  %1429 = vmatprep.subr.bf16.mxu0 %v1428_v37 }
  0x8d   :  { %1461 = vmatprep.subr.bf16.mxu1 %v1460_v42 }
  0x8f   :  { %1431 = vmatpush3.bf16.msra.mxu0 %v1430_v47 }
  0x90   :  { %1463 = vmatpush3.bf16.msra.mxu1 %v1462_v49  ;;  %1433 = vmatprep.subr.bf16.mxu0 %v1432_v50 }
  0x91   :  { %1465 = vmatprep.subr.bf16.mxu1 %v1464_v54 }
  0x93   :  { %1435 = vmatpush3.bf16.msra.mxu0 %v1434_v56 }
  0x94   :  { %1467 = vmatpush3.bf16.msra.mxu1 %v1466_v58 }
  0x96   :  { %850 = vmatmul.mubr.f32.vlgmr.msra.gmra.mrb[6].mxu0 %v336_v59 }
  0x97   :  { %920 = vmatmul.mubr.f32.vlgmr.msra.gmra.mrb[6].mxu1 %v344_v20 }
 0x109   :  { %v964_v57 = vpop.f32.mrb[0].mxu0 }
 0x10a   :  { %v999_v60 = vpop.f32.mrb[0].mxu1  ;;  %v965_v62 = vpop.f32.mrb[1].mxu0 }
 0x10b   :  { %v966_v63 = vadd.f32 %v965_v62, %v964_v57  ;;  %v1000_v0 = vpop.f32.mrb[1].mxu1 }
 0x10c   :  { %v1001_v1 = vadd.f32 %v1000_v0, %v999_v60 }
 0x10e   :  { %v502_v2 = vadd.f32 %v1001_v1, %v966_v63 }
 0x129   :  { %v1034_v3 = vpop.f32.mrb[2].mxu0 }
 0x12a   :  { %v1035_v4 = vpop.f32.mrb[3].mxu0  ;;  %v1069_v5 = vpop.f32.mrb[2].mxu1 }
 0x12b   :  { %v1036_v6 = vadd.f32 %v1035_v4, %v1034_v3  ;;  %v1070_v27 = vpop.f32.mrb[3].mxu1 }
 0x12c   :  { %v1071_v10 = vadd.f32 %v1070_v27, %v1069_v5 }
 0x12d   :  { %v572_v7 = vadd.f32 %v1036_v6, %v502_v2 }
 0x12f   :  { %v642_v61 = vadd.f32 %v1071_v10, %v572_v7 }
 0x149   :  { %v1104_v8 = vpop.f32.mrb[4].mxu0 }
 0x14a   :  { %v1105_v31 = vpop.f32.mrb[5].mxu0  ;;  %v1139_v48 = vpop.f32.mrb[4].mxu1 }
 0x14b   :  { %v1106_v9 = vadd.f32 %v1105_v31, %v1104_v8  ;;  %v1140_v12 = vpop.f32.mrb[5].mxu1 }
 0x14c   :  { %v1141_v11 = vadd.f32 %v1140_v12, %v1139_v48 }
 0x14d   :  { %v712_v13 = vadd.f32 %v1106_v9, %v642_v61 }
 0x14f   :  { %v782_v14 = vadd.f32 %v1141_v11, %v712_v13 }
 0x169   :  { %v1174_v15 = vpop.f32.mrb[6].mxu0 }
 0x16a   :  { %v1175_v16 = vpop.f32.mrb[7].mxu0  ;;  %v1209_v17 = vpop.f32.mrb[6].mxu1 }
 0x16b   :  { %v1176_v18 = vadd.f32 %v1175_v16, %v1174_v15  ;;  %v1210_v19 = vpop.f32.mrb[7].mxu1 }
 0x16c   :  { %v1211_v21 = vadd.f32 %v1210_v19, %v1209_v17 }
 0x16d   :  { %v852_v22 = vadd.f32 %v1176_v18, %v782_v14 }
 0x16f   :  { %v922_v23 = vadd.f32 %v1211_v21, %v852_v22 }
 0x171   :  { %926 = vst.msk [vmem:[%s1598_s2] sm:$0x1] %vm925_vm0, %v922_v23 }
 0x172   :  { %931 = vsyncpa [#allocation3], 1 }

</bundles_post_ra>
